<compile_context>
chip_gen: v5e
topology: v5e:2x2
jax: 0.10.0
libtpu: 0.0.40
codegen_flags: <defaults>
</compile_context>

<pallas_src>
import functools

import jax
import jax.numpy as jnp
from jax.experimental import pallas as pl
from jax.experimental.pallas import tpu as pltpu


# ----------------------------- Pallas kernels -----------------------------

def _se_fused_kernel(x_ref, w1_ref, w2_ref, o_ref):
    """One batch sample: GAP -> FC1(relu) -> FC2(sigmoid) -> x * gate."""
    x = x_ref[...].astype(jnp.float32)                         # (1, C, HW)
    pooled = jnp.mean(x[0], axis=1, keepdims=True)             # (C, 1)
    h = jnp.dot(w1_ref[...].astype(jnp.float32), pooled,
                preferred_element_type=jnp.float32)            # (Cr, 1)
    h = jnp.maximum(h, 0.0)
    s = jnp.dot(w2_ref[...].astype(jnp.float32), h,
                preferred_element_type=jnp.float32)            # (C, 1)
    s = 1.0 / (1.0 + jnp.exp(-s))                              # sigmoid gate
    o_ref[...] = (x * s[None]).astype(o_ref.dtype)             # lane broadcast


def _se_gate_kernel(x_ref, w1_ref, w2_ref, s_ref, acc_ref, *, inv_hw):
    """Tiled pass 1: accumulate spatial sum; at last tile compute the gate."""
    t = pl.program_id(1)

    @pl.when(t == 0)
    def _():
        acc_ref[...] = jnp.zeros_like(acc_ref)

    acc_ref[...] += jnp.sum(x_ref[0].astype(jnp.float32),
                            axis=1, keepdims=True)             # (C, 1)

    @pl.when(t == pl.num_programs(1) - 1)
    def _():
        pooled = acc_ref[...] * inv_hw                         # (C, 1)
        h = jnp.dot(w1_ref[...].astype(jnp.float32), pooled,
                    preferred_element_type=jnp.float32)        # (Cr, 1)
        h = jnp.maximum(h, 0.0)
        s = jnp.dot(w2_ref[...].astype(jnp.float32), h,
                    preferred_element_type=jnp.float32)        # (C, 1)
        s_ref[...] = (1.0 / (1.0 + jnp.exp(-s)))[None]         # (1, C, 1)


def _se_scale_kernel(x_ref, s_ref, o_ref):
    """Tiled pass 2: rescale one spatial tile by the per-channel gate."""
    x = x_ref[...].astype(jnp.float32)                         # (1, C, T)
    s = s_ref[...].astype(jnp.float32)                         # (1, C, 1)
    o_ref[...] = (x * s).astype(o_ref.dtype)


# ----------------------------- wrappers -----------------------------

def _pick_spatial_tile(hw, c, itemsize, target_bytes=2 * 1024 * 1024):
    """Largest divisor of hw that is a multiple of 128 (lane dim) within budget."""
    max_t = max(128, (target_bytes // max(1, c * itemsize)) // 128 * 128)
    if hw <= max_t:
        return hw
    t = (max_t // 128) * 128
    while t >= 128:
        if hw % t == 0:
            return t
        t -= 128
    # TODO(synk): ragged spatial extents (no multiple-of-128 divisor) fall back
    # to a single full-width tile.
    return hw


def _se_fused(x, w1, w2):
    B, C, HW = x.shape
    Cr = w1.shape[0]
    return pl.pallas_call(
        _se_fused_kernel,
        out_shape=jax.ShapeDtypeStruct((B, C, HW), x.dtype),
        grid=(B,),
        in_specs=[pl.BlockSpec((1, C, HW), lambda b: (b, 0, 0)),
                  pl.BlockSpec((Cr, C), lambda b: (0, 0)),
                  pl.BlockSpec((C, Cr), lambda b: (0, 0))],
        out_specs=pl.BlockSpec((1, C, HW), lambda b: (b, 0, 0)),
        compiler_params=pltpu.CompilerParams(
            dimension_semantics=("parallel",),
            vmem_limit_bytes=64 * 1024 * 1024),
    )(x, w1, w2)


def _se_twopass(x, w1, w2, spatial_tile=None):
    B, C, HW = x.shape
    Cr = w1.shape[0]
    itemsize = jnp.dtype(x.dtype).itemsize
    T = spatial_tile if spatial_tile is not None else _pick_spatial_tile(HW, C, itemsize)
    assert HW % T == 0, (HW, T)
    nT = HW // T

    # Pass 1: per-sample sigmoid gate (B, C, 1) with a VMEM accumulator.
    gate = pl.pallas_call(
        functools.partial(_se_gate_kernel, inv_hw=1.0 / float(HW)),
        out_shape=jax.ShapeDtypeStruct((B, C, 1), jnp.float32),
        grid=(B, nT),
        in_specs=[pl.BlockSpec((1, C, T), lambda b, t: (b, 0, t)),
                  pl.BlockSpec((Cr, C), lambda b, t: (0, 0)),
                  pl.BlockSpec((C, Cr), lambda b, t: (0, 0))],
        out_specs=pl.BlockSpec((1, C, 1), lambda b, t: (b, 0, 0)),
        scratch_shapes=[pltpu.VMEM((C, 1), jnp.float32)],
        compiler_params=pltpu.CompilerParams(
            dimension_semantics=("parallel", "arbitrary"),
            vmem_limit_bytes=64 * 1024 * 1024),
    )(x, w1, w2)

    # Pass 2: rescale x tile by tile.
    return pl.pallas_call(
        _se_scale_kernel,
        out_shape=jax.ShapeDtypeStruct((B, C, HW), x.dtype),
        grid=(B, nT),
        in_specs=[pl.BlockSpec((1, C, T), lambda b, t: (b, 0, t)),
                  pl.BlockSpec((1, C, 1), lambda b, t: (b, 0, 0))],
        out_specs=pl.BlockSpec((1, C, T), lambda b, t: (b, 0, t)),
        compiler_params=pltpu.CompilerParams(
            dimension_semantics=("parallel", "parallel"),
            vmem_limit_bytes=64 * 1024 * 1024),
    )(x, gate)


def se_block(x_nchw, w1, w2, *, max_fused_bytes=4 * 1024 * 1024,
             spatial_tile=None):
    """SEBlock forward.

    x_nchw: (B, C, H, W)   -- PyTorch NCHW layout (kept; no transposes).
    w1:     (C//r, C)      -- fc1.weight, native PyTorch (out, in) layout.
    w2:     (C, C//r)      -- fc2.weight, native PyTorch (out, in) layout.
    Returns (B, C, H, W) with the same dtype as x_nchw.
    """
    B, C, H, W = x_nchw.shape
    HW = H * W
    x = x_nchw.reshape(B, C, HW)          # free reshape (trailing dims merge)

    per_sample_bytes = C * HW * jnp.dtype(x.dtype).itemsize
    if spatial_tile is None and per_sample_bytes <= max_fused_bytes:
        out = _se_fused(x, w1, w2)
    else:
        out = _se_twopass(x, w1, w2, spatial_tile)

    return out.reshape(B, C, H, W)


# ----------------------------- reference (pure JAX) -----------------------------

def se_ref(x_nchw, w1, w2):
    xf = x_nchw.astype(jnp.float32)
    y = jnp.mean(xf, axis=(2, 3))                      # (B, C)
    y = jnp.maximum(y @ w1.T, 0.0)                     # (B, C/r)
    s = jax.nn.sigmoid(y @ w2.T)                       # (B, C)
    return xf * s[:, :, None, None]


# ----------------------------- main -----------------------------

if __name__ == "__main__":
    key = jax.random.PRNGKey(0)
    kx, k1, k2 = jax.random.split(key, 3)

    B, C, H, W = 2, 128, 16, 16
    reduction = 16
    Cr = C // reduction

    x = jax.random.normal(kx, (B, C, H, W), jnp.float32)
    # Weights in native PyTorch nn.Linear (out_features, in_features) layout.
    w1 = jax.random.normal(k1, (Cr, C), jnp.float32) / jnp.sqrt(C)
    w2 = jax.random.normal(k2, (C, Cr), jnp.float32) / jnp.sqrt(Cr)

    fused_fn = jax.jit(lambda a, b, c: se_block(a, b, c))
    tiled_fn = jax.jit(lambda a, b, c: se_block(a, b, c, spatial_tile=128))

    out_fused = fused_fn(x, w1, w2)
    out_tiled = tiled_fn(x, w1, w2)
    ref = se_ref(x, w1, w2)
    jax.block_until_ready((out_fused, out_tiled, ref))

    assert out_fused.shape == (B, C, H, W), out_fused.shape
    assert out_tiled.shape == (B, C, H, W), out_tiled.shape
    assert bool(jnp.all(jnp.isfinite(out_fused)))
    assert bool(jnp.all(jnp.isfinite(out_tiled)))
    assert bool(jnp.allclose(out_fused, ref, atol=1e-5, rtol=1e-5)), \
        float(jnp.max(jnp.abs(out_fused - ref)))
    assert bool(jnp.allclose(out_tiled, ref, atol=1e-5, rtol=1e-5)), \
        float(jnp.max(jnp.abs(out_tiled - ref)))

    print("KERNEL_OK")
</pallas_src>

<mosaic_0001>
module attributes {stable_mosaic.version = 11 : i64} {
  func.func @_se_fused_kernel(%arg0: i32, %arg1: memref<1x128x256xf32, #tpu.memory_space<vmem>>, %arg2: memref<8x128xf32, #tpu.memory_space<vmem>>, %arg3: memref<128x8xf32, #tpu.memory_space<vmem>>, %arg4: memref<1x128x256xf32, #tpu.memory_space<vmem>>) attributes {dimension_semantics = [#tpu.dimension_semantics<parallel>], iteration_bounds = array<i64: 2>, scalar_prefetch = 0 : i64, scratch_operands = 0 : i64, tpu.core_type = #tpu.core_type<tc>, window_params = [{transform_indices = @transform_0, window_bounds = array<i64: 1, 128, 256>}, {pipeline_mode = #tpu.pipeline_mode<synchronous>, transform_indices = @transform_1, window_bounds = array<i64: 8, 128>}, {pipeline_mode = #tpu.pipeline_mode<synchronous>, transform_indices = @transform_2, window_bounds = array<i64: 128, 8>}, {transform_indices = @transform_3, window_bounds = array<i64: 1, 128, 256>}]} {
    %c0 = arith.constant 0 : index
    %c0_0 = arith.constant 0 : index
    %c0_1 = arith.constant 0 : index
    %0 = vector.load %arg1[%c0, %c0_0, %c0_1] : memref<1x128x256xf32, #tpu.memory_space<vmem>>, vector<1x128x256xf32>
    %1 = vector.shape_cast %0 : vector<1x128x256xf32> to vector<128x256xf32>
    %cst = arith.constant dense<0.000000e+00> : vector<128xf32>
    %2 = vector.multi_reduction <add>, %1, %cst [1] : vector<128x256xf32> to vector<128xf32>
    %3 = vector.shape_cast %2 : vector<128xf32> to vector<128x1xf32>
    %cst_2 = arith.constant 2.560000e+02 : f32
    %4 = vector.broadcast %cst_2 : f32 to vector<128x1xf32>
    %5 = arith.divf %3, %4 : vector<128x1xf32>
    %c0_3 = arith.constant 0 : index
    %c0_4 = arith.constant 0 : index
    %6 = vector.load %arg2[%c0_3, %c0_4] : memref<8x128xf32, #tpu.memory_space<vmem>>, vector<8x128xf32>
    %cst_5 = arith.constant dense<0.000000e+00> : vector<8x1xf32>
    %7 = tpu.matmul %6, %5, %cst_5 {dimension_numbers = #tpu.dot_dimension_numbers<[1], [0], [0], [1], [0, 0, 1, 1], [], []>} : vector<8x128xf32>, vector<128x1xf32>, vector<8x1xf32> -> vector<8x1xf32>
    %cst_6 = arith.constant 0.000000e+00 : f32
    %8 = vector.broadcast %cst_6 : f32 to vector<8x1xf32>
    %9 = arith.maximumf %7, %8 : vector<8x1xf32>
    %c0_7 = arith.constant 0 : index
    %c0_8 = arith.constant 0 : index
    %10 = vector.load %arg3[%c0_7, %c0_8] : memref<128x8xf32, #tpu.memory_space<vmem>>, vector<128x8xf32>
    %cst_9 = arith.constant dense<0.000000e+00> : vector<128x1xf32>
    %11 = tpu.matmul %10, %9, %cst_9 {dimension_numbers = #tpu.dot_dimension_numbers<[1], [0], [0], [1], [0, 0, 1, 1], [], []>} : vector<128x8xf32>, vector<8x1xf32>, vector<128x1xf32> -> vector<128x1xf32>
    %cst_10 = arith.constant 0.000000e+00 : f32
    %12 = vector.broadcast %cst_10 : f32 to vector<128x1xf32>
    %13 = arith.subf %12, %11 : vector<128x1xf32>
    %14 = math.exp %13 : vector<128x1xf32>
    %cst_11 = arith.constant 1.000000e+00 : f32
    %15 = vector.broadcast %cst_11 : f32 to vector<128x1xf32>
    %16 = arith.addf %15, %14 : vector<128x1xf32>
    %cst_12 = arith.constant 1.000000e+00 : f32
    %17 = vector.broadcast %cst_12 : f32 to vector<128x1xf32>
    %18 = arith.divf %17, %16 : vector<128x1xf32>
    %19 = vector.shape_cast %18 : vector<128x1xf32> to vector<1x128x1xf32>
    %20 = vector.broadcast %19 : vector<1x128x1xf32> to vector<1x128x256xf32>
    %21 = arith.mulf %0, %20 : vector<1x128x256xf32>
    %c0_13 = arith.constant 0 : index
    %c0_14 = arith.constant 0 : index
    %c0_15 = arith.constant 0 : index
    %22 = vector.load %arg4[%c0_13, %c0_14, %c0_15] : memref<1x128x256xf32, #tpu.memory_space<vmem>>, vector<1x128x256xf32>
    tpu.vector_store %arg4[%c0_13, %c0_14, %c0_15], %21 {strides = array<i32>} : memref<1x128x256xf32, #tpu.memory_space<vmem>>, vector<1x128x256xf32>,
    return
  }
  func.func @transform_0(%arg0: i32) -> (i32, i32, i32) {
    %c0_i32 = arith.constant 0 : i32
    %c0_i32_0 = arith.constant 0 : i32
    %c0_i32_1 = arith.constant 0 : i32
    return %arg0, %c0_i32, %c0_i32_0 : i32, i32, i32
  }
  func.func @transform_1(%arg0: i32) -> (i32, i32) {
    %c0_i32 = arith.constant 0 : i32
    %c0_i32_0 = arith.constant 0 : i32
    %c0_i32_1 = arith.constant 0 : i32
    return %c0_i32, %c0_i32_0 : i32, i32
  }
  func.func @transform_2(%arg0: i32) -> (i32, i32) {
    %c0_i32 = arith.constant 0 : i32
    %c0_i32_0 = arith.constant 0 : i32
    %c0_i32_1 = arith.constant 0 : i32
    return %c0_i32, %c0_i32_0 : i32, i32
  }
  func.func @transform_3(%arg0: i32) -> (i32, i32, i32) {
    %c0_i32 = arith.constant 0 : i32
    %c0_i32_0 = arith.constant 0 : i32
    %c0_i32_1 = arith.constant 0 : i32
    return %arg0, %c0_i32, %c0_i32_0 : i32, i32, i32
  }
}

</mosaic_0001>

<bundles_post_ra>
// kernel: _lambda_.1
= control target key start
LH: loop header
LB: loop body
LE: loop exit
PB: predicated region body
PF: predicated region fallthrough
CT: control target
= control target key end

     0   :  { %s1089_s12 = smov 0   ;;  %s1619_s0 = inlined_call_operand.vmem [shape: f32[2,128,256], index: 0, kind: input, shape index: {}]   ;;  %s1620_s1 = inlined_call_operand.vmem [shape: f32[8,128], index: 1, kind: input, shape index: {}]   ;;  %s1621_s2 = inlined_call_operand.vmem [shape: f32[128,8], index: 2, kind: input, shape index: {}]   ;;  %s1622_s3 = inlined_call_operand.vmem [shape: f32[2,128,256], index: 3, kind: output, shape index: {}]  }
   0x1 LB: > { %s929_s13 = sadd.s32 4294967295, %s1065_s12   ;;  %p933_p0 = scmp.ge.s32.totalorder %s1065_s12, 1  ;;  %s1065_s12 = sphi %s1089_s12, %s13_s12  }
   0x2   : > { %p137_p1 = scmp.lt.s32.totalorder %s1065_s12, 3 }
   0x4   : > { %p138_p2 = pnand %p933_p0, %p137_p1 }
   0x5   : > { %p161_p3 = scmp.lt.s32.totalorder (!%p138_p2), %s929_s13, 1 }
   0x6   : > { %141 = sbr.rel (%p138_p2) target bundleno = 635 (0x27b), region = 32 }
   0xb   : > { %s1652_s13 = smov (!%p161_p3, %s929_s13), 1  ;;  %v1067_v48 = vmov 256.0   ;;  %vm312_vm1 = vcmask 64512  }
   0xc   : > { %s956_s14 = sshll.u32 %s1652_s13, 8  ;;  %973 = vrcp.f32 %v1067_v48  ;;  %v305_v48 = vld [vmem:[%s1621_s2 + $0x48] sm:$0xff] }
   0xd   : > { %s1105_s17 = scalar_lea.vmem %s1619_s0, %s956_s14  ;;  %s1550_s4 = scalar_lea.vmem %s1622_s3, %s956_s14 }
   0xe   : > { %v201_v0 = vld [vmem:[%s1105_s17 + $0xf0] sm:$0xff]  ;;  %v202_v1 = vld [vmem:[%s1105_s17 + $0xf8] sm:$0xff]  ;;  %v199_v9 = vld [vmem:[%s1105_s17 + $0xe0] sm:$0xff] }
   0xf   : > { %v197_v2 = vld [vmem:[%s1105_s17 + $0xd0] sm:$0xff]  ;;  %v248_v3 = vadd.f32 %v202_v1, %v201_v0  ;;  %v198_v4 = vld [vmem:[%s1105_s17 + $0xd8] sm:$0xff]  ;;  %v200_v10 = vld [vmem:[%s1105_s17 + $0xe8] sm:$0xff] }
  0x10   : > { %v193_v5 = vld [vmem:[%s1105_s17 + $0xb0] sm:$0xff]  ;;  %v194_v6 = vld [vmem:[%s1105_s17 + $0xb8] sm:$0xff]  ;;  %v242_v7 = vadd.f32 %v198_v4, %v197_v2  ;;  %v195_v11 = vld [vmem:[%s1105_s17 + $0xc0] sm:$0xff]  ;;  %v245_v15 = vadd.f32 %v200_v10, %v199_v9 }
  0x11   : > { %v236_v8 = vadd.f32 %v194_v6, %v193_v5  ;;  %249 = vadd.xlane.f32.xlu0 %v248_v3  ;;  %v196_v12 = vld [vmem:[%s1105_s17 + $0xc8] sm:$0xff]  ;;  %v191_v13 = vld [vmem:[%s1105_s17 + $0xa0] sm:$0xff]  ;;  %v189_v18 = vld [vmem:[%s1105_s17 + $0x90] sm:$0xff] }
  0x12   : > { %243 = vadd.xlane.f32.xlu1 %v242_v7  ;;  %v192_v14 = vld [vmem:[%s1105_s17 + $0xa8] sm:$0xff]  ;;  %v239_v16 = vadd.f32 %v196_v12, %v195_v11  ;;  %v190_v19 = vld [vmem:[%s1105_s17 + $0x98] sm:$0xff]  ;;  %v187_v20 = vld [vmem:[%s1105_s17 + $0x80] sm:$0xff]  ;;  %v974_v49 = vpop.eup %973 }
  0x13   : > { %237 = vadd.xlane.f32.xlu2 %v236_v8  ;;  %v233_v17 = vadd.f32 %v192_v14, %v191_v13  ;;  %v188_v21 = vld [vmem:[%s1105_s17 + $0x88] sm:$0xff]  ;;  %v1124_v22 = vld [vmem:[%s1105_s17 + $0x70] sm:$0xff]  ;;  %v1127_v23 = vld [vmem:[%s1105_s17 + $0x78] sm:$0xff]  ;;  %v230_v24 = vadd.f32 %v190_v19, %v189_v18  ;;  %v252_v50 = vmul.f32 256.0, %v974_v49  ;;  %vm256_vm0 = vweird.f32 %v974_v49 }
  0x14   : > { %v227_v25 = vadd.f32 %v188_v21, %v187_v20  ;;  %v224_v26 = vadd.f32 %v1127_v23, %v1124_v22  ;;  %v1132_v27 = vld [vmem:[%s1105_s17 + $0x60] sm:$0xff]  ;;  %v1135_v28 = vld [vmem:[%s1105_s17 + $0x68] sm:$0xff]  ;;  %v181_v29 = vld [vmem:[%s1105_s17 + $0x50] sm:$0xff] }
  0x15   : > { %v182_v30 = vld [vmem:[%s1105_s17 + $0x58] sm:$0xff]  ;;  %v179_v31 = vld [vmem:[%s1105_s17 + $0x40] sm:$0xff]  ;;  %v180_v32 = vld [vmem:[%s1105_s17 + $0x48] sm:$0xff]  ;;  %v221_v33 = vadd.f32 %v1135_v28, %v1132_v27  ;;  %v253_v51 = vsub.f32 1.0, %v252_v50 }
  0x16   : > { %v218_v34 = vadd.f32 %v182_v30, %v181_v29  ;;  %v215_v35 = vadd.f32 %v180_v32, %v179_v31  ;;  %v1144_v36 = vld [vmem:[%s1105_s17 + $0x30] sm:$0xff]  ;;  %v1147_v37 = vld [vmem:[%s1105_s17 + $0x38] sm:$0xff]  ;;  %v1150_v38 = vld [vmem:[%s1105_s17 + $0x20] sm:$0xff] }
  0x17   : > { %v1153_v39 = vld [vmem:[%s1105_s17 + $0x28] sm:$0xff]  ;;  %v1156_v40 = vld [vmem:[%s1105_s17 + $0x10] sm:$0xff]  ;;  %v1159_v41 = vld [vmem:[%s1105_s17 + $0x18] sm:$0xff]  ;;  %v212_v42 = vadd.f32 %v1147_v37, %v1144_v36  ;;  %v254_v52 = vmul.f32 %v974_v49, %v253_v51 }
  0x18   : > { %v209_v43 = vadd.f32 %v1153_v39, %v1150_v38  ;;  %v206_v44 = vadd.f32 %v1159_v41, %v1156_v40  ;;  %v1168_v45 = vld [vmem:[%s1105_s17] sm:$0xff]  ;;  %v1171_v46 = vld [vmem:[%s1105_s17 + $0x8] sm:$0xff]  ;;  %v302_v31 = vld [vmem:[%s1621_s2 + $0x30] sm:$0xff] }
  0x19   : > { %246 = vadd.xlane.f32.xlu0 %v245_v15  ;;  %v203_v47 = vadd.f32 %v1171_v46, %v1168_v45  ;;  %v255_v53 = vadd.f32 %v974_v49, %v254_v52  ;;  %v296_v30 = vld [vmem:[%s1621_s2] sm:$0xff]  ;;  %v306_v51 = vld [vmem:[%s1621_s2 + $0x50] sm:$0xff]  ;;  %v301_v52 = vld [vmem:[%s1621_s2 + $0x28] sm:$0xff] }
  0x1a   : > { %240 = vadd.xlane.f32.xlu1 %v239_v16  ;;  %v308_v32 = vld [vmem:[%s1621_s2 + $0x60] sm:$0xff] }
  0x1b   : > { %234 = vadd.xlane.f32.xlu2 %v233_v17  ;;  %v257_v54 = vsel %vm256_vm0, %v974_v49, %v255_v53  ;;  %v311_v49 = vld [vmem:[%s1621_s2 + $0x78] sm:$0xff]  ;;  %v300_v50 = vld [vmem:[%s1621_s2 + $0x20] sm:$0xff] }
  0x1c   : > { %v307_v53 = vld [vmem:[%s1621_s2 + $0x58] sm:$0xff] }
  0x21   : > { %231 = vadd.xlane.f32.xlu0 %v230_v24 }
  0x22   : > { %228 = vadd.xlane.f32.xlu1 %v227_v25  ;;  %v274_v25 = vld [vmem:[%s1620_s1] sm:$0xff] }
  0x23   : > { %225 = vadd.xlane.f32.xlu2 %v224_v26 }
  0x29   : > { %222 = vadd.xlane.f32.xlu0 %v221_v33  ;;  %v297_v33 = vld [vmem:[%s1621_s2 + $0x8] sm:$0xff] }
  0x2a   : > { %219 = vadd.xlane.f32.xlu1 %v218_v34  ;;  %v303_v34 = vld [vmem:[%s1621_s2 + $0x38] sm:$0xff] }
  0x2b   : > { %216 = vadd.xlane.f32.xlu2 %v215_v35  ;;  %v309_v35 = vld [vmem:[%s1621_s2 + $0x68] sm:$0xff] }
  0x31   : > { %213 = vadd.xlane.f32.xlu0 %v212_v42  ;;  %v298_v42 = vld [vmem:[%s1621_s2 + $0x10] sm:$0xff] }
  0x32   : > { %210 = vadd.xlane.f32.xlu1 %v209_v43  ;;  %v304_v43 = vld [vmem:[%s1621_s2 + $0x40] sm:$0xff] }
  0x33   : > { %207 = vadd.xlane.f32.xlu2 %v206_v44  ;;  %v310_v44 = vld [vmem:[%s1621_s2 + $0x70] sm:$0xff] }
  0x39   : > { %204 = vadd.xlane.f32.xlu0 %v203_v47  ;;  %v299_v47 = vld [vmem:[%s1621_s2 + $0x18] sm:$0xff] }
  0x84   : > { %v250_v55 = vpop.xlane.xlu0 %249 }
  0x85   : > { %v273_v56 = vmul.f32 %v257_v54, %v250_v55  ;;  %v244_v57 = vpop.xlane.xlu1 %243  ;;  %v1068_v55 = vmov 0  }
  0x86   : > { %v238_v58 = vpop.xlane.xlu2 %237  ;;  %v271_v63 = vmul.f32 %v257_v54, %v244_v57  ;;  %970 = vset.pattern.permute.xlu1 %v1068_v55  ;;  %972 = vset.pattern.permute.xlu2 %v1068_v55 }
  0x87   : > { %275 = vmatpush.msra.mxu0 %v273_v56  ;;  %v269_v1 = vmul.f32 %v257_v54, %v238_v58  ;;  %971 = vset.pattern.permute.xlu0 %v1068_v55 }
  0x8c   : > { %v247_v59 = vpop.xlane.xlu0 %246 }
  0x8d   : > { %v272_v60 = vmul.f32 %v257_v54, %v247_v59  ;;  %v241_v61 = vpop.xlane.xlu1 %240 }
  0x8e   : > { %v235_v62 = vpop.xlane.xlu2 %234  ;;  %v270_v0 = vmul.f32 %v257_v54, %v241_v61 }
  0x8f   : > { %276 = vmatpush.msra.mxu0 %v272_v60  ;;  %v268_v3 = vmul.f32 %v257_v54, %v235_v62 }
  0x91   : > { %277 = vmatpush.msra.mxu0 %v271_v63 }
  0x93   : > { %278 = vmatpush.msra.mxu0 %v270_v0 }
  0x94   : > { %v232_v2 = vpop.xlane.xlu0 %231 }
  0x95   : > { %279 = vmatpush.msra.mxu0 %v269_v1  ;;  %v229_v4 = vpop.xlane.xlu1 %228  ;;  %v267_v6 = vmul.f32 %v257_v54, %v232_v2 }
  0x96   : > { %v226_v5 = vpop.xlane.xlu2 %225  ;;  %v266_v7 = vmul.f32 %v257_v54, %v229_v4 }
  0x97   : > { %280 = vmatpush.msra.mxu0 %v268_v3  ;;  %v265_v8 = vmul.f32 %v257_v54, %v226_v5 }
  0x99   : > { %281 = vmatpush.msra.mxu0 %v267_v6 }
  0x9b   : > { %282 = vmatpush.msra.mxu0 %v266_v7 }
  0x9c   : > { %v223_v9 = vpop.xlane.xlu0 %222 }
  0x9d   : > { %v264_v10 = vmul.f32 %v257_v54, %v223_v9  ;;  %283 = vmatpush.msra.mxu0 %v265_v8  ;;  %v220_v11 = vpop.xlane.xlu1 %219 }
  0x9e   : > { %v217_v12 = vpop.xlane.xlu2 %216  ;;  %v263_v13 = vmul.f32 %v257_v54, %v220_v11 }
  0x9f   : > { %284 = vmatpush.msra.mxu0 %v264_v10  ;;  %v262_v14 = vmul.f32 %v257_v54, %v217_v12 }
  0xa1   : > { %285 = vmatpush.msra.mxu0 %v263_v13 }
  0xa3   : > { %286 = vmatpush.msra.mxu0 %v262_v14 }
  0xa4   : > { %v214_v15 = vpop.xlane.xlu0 %213 }
  0xa5   : > { %v261_v16 = vmul.f32 %v257_v54, %v214_v15  ;;  %v211_v17 = vpop.xlane.xlu1 %210 }
  0xa6   : > { %v208_v18 = vpop.xlane.xlu2 %207  ;;  %v260_v19 = vmul.f32 %v257_v54, %v211_v17 }
  0xa7   : > { %287 = vmatpush.msra.mxu0 %v261_v16  ;;  %v259_v20 = vmul.f32 %v257_v54, %v208_v18 }
  0xa9   : > { %288 = vmatpush.msra.mxu0 %v260_v19 }
  0xab   : > { %289 = vmatpush.msra.mxu0 %v259_v20 }
  0xac   : > { %v205_v21 = vpop.xlane.xlu0 %204 }
  0xad   : > { %v258_v24 = vmul.f32 %v257_v54, %v205_v21 }
  0xaf   : > { %290 = vmatpush.msra.mxu0 %v258_v24 }
  0xb0   : > { %291 = vmatmul.f32.vlgmr.msra.gmra.mxu0 %v274_v25 }
 0x12d   : > { %v292_v26 = vpop.f32.mrf.mxu0 }
 0x12e   : > { %v295_v29 = vmax.f32 %v292_v26, 0.0 }
 0x130   : > { %376 = vmatpush.msra.mxu1 %v295_v29  ;;  %958 = vmatpush.msra.mxu2 %v295_v29 }
 0x131   : > { %959 = vmatpush.msra.mxu3 %v295_v29  ;;  %938 = vmatmul.msk.f32.vlgmr.msra.gmra.mxu1 %vm312_vm1, %v296_v30 }
 0x132   : > { %944 = vmatmul.msk.f32.vlgmr.msra.gmra.mxu2 %vm312_vm1, %v302_v31  ;;  %950 = vmatmul.msk.f32.vlgmr.msra.gmra.mxu3 %vm312_vm1, %v308_v32 }
 0x139   : > { %939 = vmatmul.msk.f32.gmra.mxu1 %vm312_vm1, %v297_v33 }
 0x13a   : > { %945 = vmatmul.msk.f32.gmra.mxu2 %vm312_vm1, %v303_v34  ;;  %951 = vmatmul.msk.f32.gmra.mxu3 %vm312_vm1, %v309_v35 }
 0x141   : > { %940 = vmatmul.msk.f32.gmra.mxu1 %vm312_vm1, %v298_v42 }
 0x142   : > { %946 = vmatmul.msk.f32.gmra.mxu2 %vm312_vm1, %v304_v43  ;;  %952 = vmatmul.msk.f32.gmra.mxu3 %vm312_vm1, %v310_v44 }
 0x149   : > { %941 = vmatmul.msk.f32.gmra.mxu1 %vm312_vm1, %v299_v47 }
 0x14a   : > { %947 = vmatmul.msk.f32.gmra.mxu2 %vm312_vm1, %v305_v48  ;;  %953 = vmatmul.msk.f32.gmra.mxu3 %vm312_vm1, %v311_v49 }
 0x151   : > { %942 = vmatmul.msk.f32.gmra.mxu1 %vm312_vm1, %v300_v50 }
 0x152   : > { %948 = vmatmul.msk.f32.gmra.mxu2 %vm312_vm1, %v306_v51 }
 0x159   : > { %943 = vmatmul.msk.f32.gmra.mxu1 %vm312_vm1, %v301_v52 }
 0x15a   : > { %949 = vmatmul.msk.f32.gmra.mxu2 %vm312_vm1, %v307_v53 }
 0x1ae   : > { %v378_v54 = vpop.f32.mrf.mxu1 }
 0x1af   : > { %v426_v56 = vsub.f32 0.0, %v378_v54 }
 0x1b1   : > { %v442_v57 = vmul.f32 1.442695, %v426_v56 }
 0x1b3   : > { %975 = vpow2.f32 %v442_v57 }
 0x1b5   : > { %v396_v58 = vpop.f32.mrf.mxu2  ;;  %v414_v59 = vpop.f32.mrf.mxu3 }
 0x1b6   : > { %v432_v60 = vsub.f32 0.0, %v396_v58  ;;  %v381_v61 = vpop.f32.mrf.mxu1  ;;  %v438_v62 = vsub.f32 0.0, %v414_v59 }
 0x1b7   : > { %v427_v63 = vsub.f32 0.0, %v381_v61 }
 0x1b8   : > { %v454_v0 = vmul.f32 1.442695, %v432_v60  ;;  %v466_v3 = vmul.f32 1.442695, %v438_v62 }
 0x1b9   : > { %v976_v1 = vpop.eup %975  ;;  %v444_v2 = vmul.f32 1.442695, %v427_v63 }
 0x1ba   : > { %v474_v4 = vadd.f32 1.0, %v976_v1  ;;  %977 = vpow2.f32 %v454_v0 }
 0x1bb   : > { %979 = vpow2.f32 %v444_v2 }
 0x1bc   : > { %981 = vrcp.f32 %v474_v4  ;;  %v499_v13 = vand.u32 2147483647, %v474_v4  ;;  %v501_v17 = vand.u32 2147483648, %v474_v4  ;;  %vm495_vm2 = vweird.f32 %v474_v4 }
 0x1bd   : > { %983 = vpow2.f32 %v466_v3  ;;  %v399_v5 = vpop.f32.mrf.mxu2  ;;  %v417_v6 = vpop.f32.mrf.mxu3 }
 0x1be   : > { %v433_v7 = vsub.f32 0.0, %v399_v5  ;;  %v384_v8 = vpop.f32.mrf.mxu1  ;;  %v439_v12 = vsub.f32 0.0, %v417_v6  ;;  %vm1250_vm3 = vcmp.eq.f32.partialorder %v499_v13, 8.507059e+37  ;;  %v502_v32 = vor.u32 1.1754944e-38, %v501_v17 }
 0x1bf   : > { %v428_v9 = vsub.f32 0.0, %v384_v8 }
 0x1c0   : > { %v978_v10 = vpop.eup %977  ;;  %v456_v11 = vmul.f32 1.442695, %v433_v7  ;;  %v468_v25 = vmul.f32 1.442695, %v439_v12 }
 0x1c1   : > { %v980_v14 = vpop.eup %979  ;;  %v1242_v15 = vadd.f32 1.0, %v978_v10  ;;  %v446_v16 = vmul.f32 1.442695, %v428_v9 }
 0x1c2   : > { %v982_v18 = vpop.eup %981  ;;  %v1244_v19 = vadd.f32 1.0, %v980_v14  ;;  %985 = vpow2.f32 %v456_v11 }
 0x1c3   : > { %v984_v20 = vpop.eup %983  ;;  %987 = vrcp.f32 %v1242_v15  ;;  %v491_v21 = vmul.f32 %v982_v18, %v474_v4  ;;  %vm496_vm4 = vweird.f32 %v982_v18  ;;  %v589_v42 = vand.u32 2147483647, %v1242_v15 }
 0x1c4   : > { %989 = vrcp.f32 %v1244_v19  ;;  %v1248_v24 = vadd.f32 1.0, %v984_v20  ;;  %v591_v48 = vand.u32 2147483648, %v1242_v15  ;;  %vm585_vm5 = vweird.f32 %v1242_v15  ;;  %vm497_vm7 = vmor %vm495_vm2, %vm496_vm4 }
 0x1c5   : > { %991 = vpow2.f32 %v446_v16  ;;  %v402_v29 = vpop.f32.mrf.mxu2  ;;  %v420_v30 = vpop.f32.mrf.mxu3  ;;  %v492_v31 = vsub.f32 1.0, %v491_v21  ;;  %vm510_vm6 = vweird.f32 %v1244_v19  ;;  %v514_v59 = vand.u32 2147483647, %v1244_v19 }
 0x1c6   : > { %993 = vrcp.f32 %v1248_v24  ;;  %v434_v33 = vsub.f32 0.0, %v402_v29  ;;  %v387_v34 = vpop.f32.mrf.mxu1  ;;  %v440_v35 = vsub.f32 0.0, %v420_v30  ;;  %v679_v47 = vand.u32 2147483647, %v1248_v24 }
 0x1c7   : > { %v429_v43 = vsub.f32 0.0, %v387_v34  ;;  %v493_v44 = vmul.f32 %v982_v18, %v492_v31  ;;  %995 = vpow2.f32 %v468_v25  ;;  %v681_v56 = vand.u32 2147483648, %v1248_v24 }
 0x1c8   : > { %v986_v49 = vpop.eup %985  ;;  %v458_v50 = vmul.f32 1.442695, %v434_v33  ;;  %v470_v51 = vmul.f32 1.442695, %v440_v35  ;;  %vm675_vm8 = vweird.f32 %v1248_v24  ;;  %vm1274_vm9 = vcmp.eq.f32.partialorder %v679_v47, 8.507059e+37 }
 0x1c9   : > { %v1260_v52 = vpop.eup %987  ;;  %v1262_v53 = vadd.f32 1.0, %v986_v49  ;;  %v448_v54 = vmul.f32 1.442695, %v429_v43  ;;  %v494_v55 = vadd.f32 %v982_v18, %v493_v44  ;;  %vm1278_vm10 = vcmp.eq.f32.partialorder %v589_v42, 8.507059e+37 }
 0x1ca   : > { %v1265_v57 = vpop.eup %989  ;;  %997 = vpow2.f32 %v458_v50  ;;  %v581_v58 = vmul.f32 %v1260_v52, %v1242_v15  ;;  %v682_v8 = vor.u32 1.1754944e-38, %v681_v56  ;;  %vm586_vm12 = vweird.f32 %v1260_v52 }
 0x1cb   : > { %v992_v60 = vpop.eup %991  ;;  %999 = vrcp.f32 %v1262_v53  ;;  %v498_v61 = vsel %vm497_vm7, %v982_v18, %v494_v55  ;;  %v506_v0 = vmul.f32 %v1265_v57, %v1244_v19  ;;  %v592_v25 = vor.u32 1.1754944e-38, %v591_v48  ;;  %vm1303_vm14 = vmor %vm585_vm5, %vm586_vm12 }
 0x1cc   : > { %v994_v1 = vpop.eup %993  ;;  %v1284_v2 = vadd.f32 1.0, %v992_v60  ;;  %1001 = vpow2.f32 %v448_v54  ;;  %v503_v3 = vsel %vm1250_vm3, %v502_v32, %v498_v61  ;;  %v582_v4 = vsub.f32 1.0, %v581_v58 }
 0x1cd   : > { %v405_v5 = vpop.f32.mrf.mxu2  ;;  %1003 = vpow2.f32 %v470_v51  ;;  %732 = vperm.xlu1 %970, %v503_v3   ;;  %v423_v6 = vpop.f32.mrf.mxu3  ;;  %v671_v7 = vmul.f32 %v994_v1, %v1248_v24  ;;  %v507_v9 = vsub.f32 1.0, %v506_v0  ;;  %vm676_vm11 = vweird.f32 %v994_v1 }
 0x1ce   : > { %v996_v10 = vpop.eup %995  ;;  %v435_v11 = vsub.f32 0.0, %v405_v5  ;;  %v390_v12 = vpop.f32.mrf.mxu1  ;;  %v441_v13 = vsub.f32 0.0, %v423_v6  ;;  %v583_v17 = vmul.f32 %v1260_v52, %v582_v4  ;;  %1005 = vrcp.f32 %v1284_v2  ;;  %vm1310_vm15 = vmor %vm675_vm8, %vm676_vm11 }
 0x1cf   : > { %v430_v14 = vsub.f32 0.0, %v390_v12  ;;  %v672_v16 = vsub.f32 1.0, %v671_v7  ;;  %v508_v18 = vmul.f32 %v1265_v57, %v507_v9  ;;  %vm511_vm13 = vweird.f32 %v1265_v57 }
 0x1d0   : > { %v998_v20 = vpop.eup %997  ;;  %v460_v21 = vmul.f32 1.442695, %v435_v11  ;;  %v584_v32 = vadd.f32 %v1260_v52, %v583_v17  ;;  %v472_v35 = vmul.f32 1.442695, %v441_v13  ;;  %v516_v44 = vand.u32 2147483648, %v1244_v19  ;;  %vm1326_vm0 = vmor %vm510_vm6, %vm511_vm13 }
 0x1d1   : > { %v1294_v26 = vpop.eup %999  ;;  %v1296_v29 = vadd.f32 1.0, %v998_v20  ;;  %v450_v30 = vmul.f32 1.442695, %v430_v14  ;;  %v673_v31 = vmul.f32 %v994_v1, %v672_v16  ;;  %v509_v43 = vadd.f32 %v1265_v57, %v508_v18 }
 0x1d2   : > { %v1002_v34 = vpop.eup %1001  ;;  %1007 = vpow2.f32 %v460_v21  ;;  %v588_v49 = vsel %vm1303_vm14, %v1260_v52, %v584_v32  ;;  %v1337_v55 = vadd.f32 1.0, %v996_v10  ;;  %v517_v58 = vor.u32 1.1754944e-38, %v516_v44 }
 0x1d3   : > { %v1004_v47 = vpop.eup %1003  ;;  %1009 = vrcp.f32 %v1296_v29  ;;  %v1317_v15 = vadd.f32 1.0, %v1002_v34  ;;  %v674_v48 = vadd.f32 %v994_v1, %v673_v31  ;;  %v593_v51 = vsel %vm1278_vm10, %v592_v25, %v588_v49 }
 0x1d4   : > { %v1330_v50 = vadd.f32 1.0, %v1004_v47  ;;  %1011 = vpow2.f32 %v450_v30  ;;  %v513_v54 = vsel %vm1326_vm0, %v1265_v57, %v509_v43  ;;  %v596_v60 = vmul.f32 %v1294_v26, %v1262_v53  ;;  %v1343_v61 = vpop.eup %1005 }
 0x1d5   : > { %v408_v52 = vpop.f32.mrf.mxu2  ;;  %v678_v56 = vsel %vm1310_vm15, %v994_v1, %v674_v48  ;;  %762 = vperm.xlu1 %970, %v593_v51   ;;  %1013 = vrcp.f32 %v1317_v15  ;;  %vm515_vm1 = vcmp.eq.f32.partialorder %v514_v59, 8.507059e+37  ;;  %vm601_vm2 = vweird.f32 %v1294_v26 }
 0x1d6   : > { %v436_v63 = vsub.f32 0.0, %v408_v52  ;;  %v683_v0 = vsel %vm1274_vm9, %v682_v8, %v678_v56  ;;  %v393_v57 = vpop.f32.mrf.mxu1  ;;  %1015 = vpow2.f32 %v472_v35  ;;  %v518_v1 = vsel %vm515_vm1, %v517_v58, %v513_v54 }
 0x1d7   : > { %792 = vperm.xlu0 %971, %v683_v0   ;;  %v431_v3 = vsub.f32 0.0, %v393_v57  ;;  %v597_v4 = vsub.f32 1.0, %v596_v60  ;;  %1017 = vrcp.f32 %v1330_v50  ;;  %737 = vperm.xlu2 %972, %v518_v1   ;;  %v606_v7 = vand.u32 2147483648, %v1262_v53 }
 0x1d8   : > { %v1008_v5 = vpop.eup %1007  ;;  %v462_v6 = vmul.f32 1.442695, %v436_v63  ;;  %v521_v9 = vmul.f32 %v1343_v61, %v1284_v2  ;;  %vm600_vm3 = vweird.f32 %v1262_v53  ;;  %v604_v11 = vand.u32 2147483647, %v1262_v53 }
 0x1d9   : > { %v1353_v62 = vpop.eup %1009  ;;  %v1355_v8 = vadd.f32 1.0, %v1008_v5  ;;  %v452_v19 = vmul.f32 1.442695, %v431_v3  ;;  %v598_v59 = vmul.f32 %v1294_v26, %v597_v4  ;;  %v607_v12 = vor.u32 1.1754944e-38, %v606_v7  ;;  %vm1370_vm4 = vmor %vm600_vm3, %vm601_vm2 }
 0x1da   : > { %v1012_v10 = vpop.eup %1011  ;;  %1019 = vpow2.f32 %v462_v6  ;;  %v522_v16 = vsub.f32 1.0, %v521_v9  ;;  %vm525_vm5 = vweird.f32 %v1284_v2  ;;  %v529_v53 = vand.u32 2147483647, %v1284_v2 }
 0x1db   : > { %1021 = vrcp.f32 %v1355_v8  ;;  %v1363_v13 = vadd.f32 1.0, %v1012_v10  ;;  %v599_v14 = vadd.f32 %v1294_v26, %v598_v59  ;;  %v1366_v17 = vpop.eup %1013  ;;  %v531_v20 = vand.u32 2147483648, %v1284_v2 }
 0x1dc   : > { %1023 = vpow2.f32 %v452_v19  ;;  %v1016_v21 = vpop.eup %1015  ;;  %v523_v31 = vmul.f32 %v1343_v61, %v522_v16  ;;  %vm526_vm6 = vweird.f32 %v1343_v61  ;;  %v611_v32 = vmul.f32 %v1353_v62, %v1296_v29 }
 0x1dd   : > { %v411_v25 = vpop.f32.mrf.mxu2  ;;  %v603_v30 = vsel %vm1370_vm4, %v1294_v26, %v599_v14  ;;  %v1384_v33 = vpop.eup %1017  ;;  %1025 = vrcp.f32 %v1363_v13  ;;  %v1387_v34 = vadd.f32 1.0, %v1016_v21  ;;  %vm605_vm7 = vcmp.eq.f32.partialorder %v604_v11, 8.507059e+37  ;;  %vm527_vm9 = vmor %vm525_vm5, %vm526_vm6 }
 0x1de   : > { %v437_v35 = vsub.f32 0.0, %v411_v25  ;;  %v608_v42 = vsel %vm605_vm7, %v607_v12, %v603_v30  ;;  %v524_v43 = vadd.f32 %v1343_v61, %v523_v31  ;;  %vm1390_vm8 = vcmp.eq.f32.partialorder %v529_v53, 8.507059e+37 }
 0x1df   : > { %v612_v44 = vsub.f32 1.0, %v611_v32  ;;  %767 = vperm.xlu2 %972, %v608_v42   ;;  %v532_v49 = vor.u32 1.1754944e-38, %v531_v20  ;;  %vm616_vm10 = vweird.f32 %v1353_v62  ;;  %v619_v24 = vand.u32 2147483647, %v1296_v29 }
 0x1e0   : > { %v1020_v47 = vpop.eup %1019  ;;  %v464_v48 = vmul.f32 1.442695, %v437_v35  ;;  %v528_v52 = vsel %vm527_vm9, %v1343_v61, %v524_v43  ;;  %v621_v58 = vand.u32 2147483648, %v1296_v29  ;;  %vm615_vm11 = vweird.f32 %v1296_v29 }
 0x1e1   : > { %v1398_v51 = vpop.eup %1021  ;;  %v1400_v54 = vadd.f32 1.0, %v1020_v47  ;;  %v613_v56 = vmul.f32 %v1353_v62, %v612_v44  ;;  %v533_v2 = vsel %vm1390_vm8, %v532_v49, %v528_v52  ;;  %v536_v63 = vmul.f32 %v1366_v17, %v1317_v15  ;;  %vm617_vm13 = vmor %vm615_vm11, %vm616_vm10 }
 0x1e2   : > { %v1024_v60 = vpop.eup %1023  ;;  %1027 = vpow2.f32 %v464_v48  ;;  %742 = vperm.xlu0 %971, %v533_v2   ;;  %vm620_vm12 = vcmp.eq.f32.partialorder %v619_v24, 8.507059e+37  ;;  %v622_v1 = vor.u32 1.1754944e-38, %v621_v58  ;;  %v544_v3 = vand.u32 2147483647, %v1317_v15 }
 0x1e3   : > { %1029 = vrcp.f32 %v1387_v34  ;;  %v1411_v0 = vadd.f32 1.0, %v1024_v60  ;;  %v614_v61 = vadd.f32 %v1353_v62, %v613_v56  ;;  %v1414_v57 = vpop.eup %1025  ;;  %v537_v29 = vsub.f32 1.0, %v536_v63 }
 0x1e4   : > { %1031 = vrcp.f32 %v1400_v54  ;;  %vm540_vm14 = vweird.f32 %v1317_v15  ;;  %v546_v5 = vand.u32 2147483648, %v1317_v15  ;;  %v626_v6 = vmul.f32 %v1398_v51, %v1355_v8 }
 0x1e5   : > { %v618_v4 = vsel %vm617_vm13, %v1353_v62, %v614_v61  ;;  %1033 = vrcp.f32 %v1411_v0  ;;  %v538_v19 = vmul.f32 %v1366_v17, %v537_v29  ;;  %vm541_vm15 = vweird.f32 %v1366_v17 }
 0x1e6   : > { %v623_v7 = vsel %vm620_vm12, %v622_v1, %v618_v4  ;;  %vm1428_vm0 = vcmp.eq.f32.partialorder %v544_v3, 8.507059e+37  ;;  %v627_v62 = vsub.f32 1.0, %v626_v6  ;;  %vm630_vm1 = vweird.f32 %v1355_v8  ;;  %vm542_vm2 = vmor %vm540_vm14, %vm541_vm15 }
 0x1e7   : > { %772 = vperm.xlu1 %970, %v623_v7   ;;  %v634_v9 = vand.u32 2147483647, %v1355_v8  ;;  %v539_v11 = vadd.f32 %v1366_v17, %v538_v19  ;;  %v547_v12 = vor.u32 1.1754944e-38, %v546_v5  ;;  %v636_v14 = vand.u32 2147483648, %v1355_v8 }
 0x1e8   : > { %v1028_v10 = vpop.eup %1027  ;;  %v551_v16 = vmul.f32 %v1414_v57, %v1363_v13  ;;  %v628_v20 = vmul.f32 %v1398_v51, %v627_v62  ;;  %vm631_vm3 = vweird.f32 %v1398_v51  ;;  %vm555_vm4 = vweird.f32 %v1363_v13 }
 0x1e9   : > { %v1030_v18 = vpop.eup %1029  ;;  %v1438_v53 = vadd.f32 1.0, %v1028_v10  ;;  %v543_v25 = vsel %vm542_vm2, %v1366_v17, %v539_v11  ;;  %vm1448_vm5 = vcmp.eq.f32.partialorder %v634_v9, 8.507059e+37  ;;  %v559_v32 = vand.u32 2147483647, %v1363_v13  ;;  %vm632_vm6 = vmor %vm630_vm1, %vm631_vm3 }
 0x1ea   : > { %v1445_v21 = vpop.eup %1031  ;;  %v552_v31 = vsub.f32 1.0, %v551_v16  ;;  %v548_v15 = vsel %vm1428_vm0, %v547_v12, %v543_v25  ;;  %v629_v35 = vadd.f32 %v1398_v51, %v628_v20  ;;  %v561_v42 = vand.u32 2147483648, %v1363_v13 }
 0x1eb   : > { %1035 = vrcp.f32 %v1438_v53  ;;  %v1458_v43 = vpop.eup %1033  ;;  %747 = vperm.xlu2 %972, %v548_v15   ;;  %v637_v17 = vor.u32 1.1754944e-38, %v636_v14  ;;  %vm556_vm7 = vweird.f32 %v1414_v57  ;;  %v716_v44 = vmul.f32 %v1030_v18, %v1387_v34 }
 0x1ec   : > { %v553_v26 = vmul.f32 %v1414_v57, %v552_v31  ;;  %v633_v47 = vsel %vm632_vm6, %v1398_v51, %v629_v35  ;;  %vm720_vm8 = vweird.f32 %v1387_v34  ;;  %vm721_vm9 = vweird.f32 %v1030_v18  ;;  %vm557_vm10 = vmor %vm555_vm4, %vm556_vm7 }
 0x1ed   : > { %v724_v48 = vand.u32 2147483647, %v1387_v34  ;;  %v638_v49 = vsel %vm1448_vm5, %v637_v17, %v633_v47  ;;  %v717_v24 = vsub.f32 1.0, %v716_v44  ;;  %v726_v52 = vand.u32 2147483648, %v1387_v34  ;;  %vm1486_vm13 = vmor %vm720_vm8, %vm721_vm9 }
 0x1ee   : > { %v554_v8 = vadd.f32 %v1414_v57, %v553_v26  ;;  %1037 = vrcp.f32 %v1337_v55  ;;  %777 = vperm.xlu0 %971, %v638_v49   ;;  %vm560_vm11 = vcmp.eq.f32.partialorder %v559_v32, 8.507059e+37  ;;  %v562_v51 = vor.u32 1.1754944e-38, %v561_v42 }
 0x1ef   : > { %v641_v56 = vmul.f32 %v1445_v21, %v1400_v54  ;;  %v718_v60 = vmul.f32 %v1030_v18, %v717_v24  ;;  %vm1478_vm12 = vcmp.eq.f32.partialorder %v724_v48, 8.507059e+37  ;;  %v649_v63 = vand.u32 2147483647, %v1400_v54 }
 0x1f0   : > { %v558_v58 = vsel %vm557_vm10, %v1414_v57, %v554_v8  ;;  %v727_v29 = vor.u32 1.1754944e-38, %v726_v52  ;;  %v651_v57 = vand.u32 2147483648, %v1400_v54  ;;  %vm645_vm14 = vweird.f32 %v1400_v54 }
 0x1f1   : > { %v1036_v61 = vpop.eup %1035  ;;  %v563_v1 = vsel %vm560_vm11, %v562_v51, %v558_v58  ;;  %v642_v3 = vsub.f32 1.0, %v641_v56  ;;  %v719_v4 = vadd.f32 %v1030_v18, %v718_v60  ;;  %vm646_vm15 = vweird.f32 %v1445_v21 }
 0x1f2   : > { %752 = vperm.xlu1 %970, %v563_v1   ;;  %v656_v5 = vmul.f32 %v1036_v61, %v1438_v53  ;;  %vm1495_vm0 = vcmp.eq.f32.partialorder %v649_v63, 8.507059e+37  ;;  %vm660_vm1 = vweird.f32 %v1438_v53  ;;  %vm661_vm2 = vweird.f32 %v1036_v61  ;;  %vm647_vm3 = vmor %vm645_vm14, %vm646_vm15 }
 0x1f3   : > { %v643_v6 = vmul.f32 %v1445_v21, %v642_v3  ;;  %v723_v7 = vsel %vm1486_vm13, %v1030_v18, %v719_v4  ;;  %v664_v59 = vand.u32 2147483647, %v1438_v53  ;;  %v566_v62 = vmul.f32 %v1458_v43, %v1411_v0  ;;  %vm662_vm6 = vmor %vm660_vm1, %vm661_vm2 }
 0x1f4   : > { %v657_v19 = vsub.f32 1.0, %v656_v5  ;;  %v1038_v9 = vpop.eup %1037  ;;  %v728_v10 = vsel %vm1478_vm12, %v727_v29, %v723_v7  ;;  %v652_v12 = vor.u32 1.1754944e-38, %v651_v57  ;;  %v666_v14 = vand.u32 2147483648, %v1438_v53 }
 0x1f5   : > { %v644_v11 = vadd.f32 %v1445_v21, %v643_v6  ;;  %v567_v18 = vsub.f32 1.0, %v566_v62  ;;  %vm570_vm4 = vweird.f32 %v1411_v0  ;;  %vm571_vm5 = vweird.f32 %v1458_v43 }
 0x1f6   : > { %v658_v16 = vmul.f32 %v1036_v61, %v657_v19  ;;  %807 = vperm.xlu0 %971, %v728_v10   ;;  %v574_v25 = vand.u32 2147483647, %v1411_v0  ;;  %v576_v30 = vand.u32 2147483648, %v1411_v0  ;;  %v701_v31 = vmul.f32 %v1384_v33, %v1330_v50  ;;  %vm1526_vm8 = vmor %vm570_vm4, %vm571_vm5  ;;  %v1042_v10 = vld [vmem:[%s1105_s17 + $0xa8] sm:$0xff] }
 0x1f7   : > { %v648_v20 = vsel %vm647_vm3, %v1445_v21, %v644_v11  ;;  %vm665_vm7 = vcmp.eq.f32.partialorder %v664_v59, 8.507059e+37  ;;  %v568_v15 = vmul.f32 %v1458_v43, %v567_v18  ;;  %v667_v21 = vor.u32 1.1754944e-38, %v666_v14  ;;  %v1040_v59 = vld [vmem:[%s1105_s17 + $0xc8] sm:$0xff]  ;;  %v1043_v18 = vld [vmem:[%s1105_s17 + $0x80] sm:$0xff] }
 0x1f8   : > { %v653_v54 = vsel %vm1495_vm0, %v652_v12, %v648_v20  ;;  %v659_v32 = vadd.f32 %v1036_v61, %v658_v16  ;;  %v577_v0 = vor.u32 1.1754944e-38, %v576_v30  ;;  %v702_v42 = vsub.f32 1.0, %v701_v31 }
 0x1f9   : > { %782 = vperm.xlu2 %972, %v653_v54   ;;  %vm705_vm9 = vweird.f32 %v1330_v50  ;;  %v569_v26 = vadd.f32 %v1458_v43, %v568_v15  ;;  %vm706_vm10 = vweird.f32 %v1384_v33  ;;  %v686_v53 = vmul.f32 %v1038_v9, %v1337_v55 }
 0x1fa   : > { %v663_v17 = vsel %vm662_vm6, %v1036_v61, %v659_v32  ;;  %vm575_vm11 = vcmp.eq.f32.partialorder %v574_v25, 8.507059e+37  ;;  %v703_v47 = vmul.f32 %v1384_v33, %v702_v42  ;;  %v711_v48 = vand.u32 2147483648, %v1330_v50  ;;  %vm707_vm12 = vmor %vm705_vm9, %vm706_vm10  ;;  %v1044_v25 = vld [vmem:[%s1105_s17 + $0x88] sm:$0xff] }
 0x1fb   : > { %v668_v44 = vsel %vm665_vm7, %v667_v21, %v663_v17  ;;  %v573_v49 = vsel %vm1526_vm8, %v1458_v43, %v569_v26  ;;  %v709_v8 = vand.u32 2147483647, %v1330_v50  ;;  %v687_v24 = vsub.f32 1.0, %v686_v53  ;;  %v1047_v21 = vld [vmem:[%s1105_s17 + $0x90] sm:$0xff] }
 0x1fc   : > { %787 = vperm.xlu1 %970, %v668_v44   ;;  %v704_v52 = vadd.f32 %v1384_v33, %v703_v47  ;;  %v578_v51 = vsel %vm575_vm11, %v577_v0, %v573_v49  ;;  %v712_v58 = vor.u32 1.1754944e-38, %v711_v48  ;;  %vm690_vm13 = vweird.f32 %v1337_v55  ;;  %v1048_v0 = vld [vmem:[%s1105_s17 + $0x98] sm:$0xff]  ;;  %v1049_v26 = vld [vmem:[%s1105_s17 + $0xd0] sm:$0xff]  ;;  %v1051_v49 = vld [vmem:[%s1105_s17 + $0x40] sm:$0xff] }
 0x1fd   : > { %v688_v56 = vmul.f32 %v1038_v9, %v687_v24  ;;  %vm691_vm14 = vweird.f32 %v1038_v9  ;;  %vm710_vm15 = vcmp.eq.f32.partialorder %v709_v8, 8.507059e+37  ;;  %v696_v2 = vand.u32 2147483648, %v1337_v55  ;;  %v1050_v44 = vld [vmem:[%s1105_s17 + $0xd8] sm:$0xff]  ;;  %v1052_v24 = vld [vmem:[%s1105_s17 + $0x48] sm:$0xff] }
 0x1fe   : > { %v708_v60 = vsel %vm707_vm12, %v1384_v33, %v704_v52  ;;  %v694_v50 = vand.u32 2147483647, %v1337_v55  ;;  %vm692_vm0 = vmor %vm690_vm13, %vm691_vm14 }
 0x1ff   : > { %v689_v43 = vadd.f32 %v1038_v9, %v688_v56  ;;  %v713_v63 = vsel %vm710_vm15, %v712_v58, %v708_v60  ;;  %v697_v61 = vor.u32 1.1754944e-38, %v696_v2  ;;  %v1053_v56 = vld [vmem:[%s1105_s17 + $0xf0] sm:$0xff]  ;;  %v1054_v60 = vld [vmem:[%s1105_s17 + $0xf8] sm:$0xff] }
 0x200   : > { %vm695_vm1 = vcmp.eq.f32.partialorder %v694_v50, 8.507059e+37  ;;  %v1055_v50 = vld [vmem:[%s1105_s17 + $0xb0] sm:$0xff] }
 0x201   : > { %757 = vperm.xlu2 %972, %v578_v51   ;;  %v693_v1 = vsel %vm692_vm0, %v1038_v9, %v689_v43 }
 0x202   : > { %v698_v13 = vsel %vm695_vm1, %v697_v61, %v693_v1  ;;  %v1056_v61 = vld [vmem:[%s1105_s17 + $0xb8] sm:$0xff] }
 0x204   : > { %802 = vperm.xlu1 %970, %v713_v63  }
 0x209   : > { %797 = vperm.xlu2 %972, %v698_v13  }
 0x231   : > { %v738_v55 = vpop.permute.xlu2 %737 }
 0x232   : > { %v812_v33 = vmul.f32 %v738_v55, %v1156_v40  ;;  %v813_v29 = vmul.f32 %v738_v55, %v1159_v41  ;;  %v1057_v55 = vld [vmem:[%s1105_s17 + $0xe0] sm:$0xff] }
 0x234   : > { %844 = vst [vmem:[%s1550_s4 + $0x10] sm:$0xff] %v812_v33 }
 0x235   : > { %845 = vst [vmem:[%s1550_s4 + $0x18] sm:$0xff] %v813_v29  ;;  %v1058_v29 = vld [vmem:[%s1105_s17 + $0xe8] sm:$0xff] }
 0x239   : > { %v768_v3 = vpop.permute.xlu2 %767 }
 0x23a   : > { %v824_v57 = vmul.f32 %v768_v3, %v1124_v22  ;;  %v825_v4 = vmul.f32 %v768_v3, %v1127_v23 }
 0x23c   : > { %856 = vst [vmem:[%s1550_s4 + $0x70] sm:$0xff] %v824_v57 }
 0x23d   : > { %857 = vst [vmem:[%s1550_s4 + $0x78] sm:$0xff] %v825_v4 }
 0x23f   : > { %v733_v5 = vpop.permute.xlu1 %732 }
 0x240   : > { %v810_v6 = vmul.f32 %v733_v5, %v1168_v45  ;;  %v811_v40 = vmul.f32 %v733_v5, %v1171_v46  ;;  %v1039_v46 = vld [vmem:[%s1105_s17 + $0xc0] sm:$0xff] }
 0x242   : > { %842 = vst [vmem:[%s1550_s4] sm:$0xff] %v810_v6 }
 0x243   : > { %843 = vst [vmem:[%s1550_s4 + $0x8] sm:$0xff] %v811_v40 }
 0x245   : > { %v748_v41 = vpop.permute.xlu2 %747 }
 0x246   : > { %v816_v22 = vmul.f32 %v748_v41, %v1144_v36  ;;  %v817_v23 = vmul.f32 %v748_v41, %v1147_v37  ;;  %v1041_v36 = vld [vmem:[%s1105_s17 + $0xa0] sm:$0xff] }
 0x247   : > { %v763_v34 = vpop.permute.xlu1 %762 }
 0x248   : > { %v822_v7 = vmul.f32 %v763_v34, %v1132_v27  ;;  %848 = vst [vmem:[%s1550_s4 + $0x30] sm:$0xff] %v816_v22  ;;  %v823_v9 = vmul.f32 %v763_v34, %v1135_v28 }
 0x249   : > { %v793_v45 = vpop.permute.xlu0 %792  ;;  %849 = vst [vmem:[%s1550_s4 + $0x38] sm:$0xff] %v817_v23 }
 0x24a   : > { %v834_v19 = vmul.f32 %v1039_v46, %v793_v45  ;;  %v835_v62 = vmul.f32 %v1040_v59, %v793_v45  ;;  %854 = vst [vmem:[%s1550_s4 + $0x60] sm:$0xff] %v822_v7 }
 0x24b   : > { %855 = vst [vmem:[%s1550_s4 + $0x68] sm:$0xff] %v823_v9 }
 0x24c   : > { %866 = vst [vmem:[%s1550_s4 + $0xc0] sm:$0xff] %v834_v19 }
 0x24d   : > { %867 = vst [vmem:[%s1550_s4 + $0xc8] sm:$0xff] %v835_v62 }
 0x253   : > { %v783_v27 = vpop.permute.xlu2 %782 }
 0x254   : > { %v830_v37 = vmul.f32 %v1041_v36, %v783_v27  ;;  %v831_v11 = vmul.f32 %v1042_v10, %v783_v27  ;;  %v743_v12 = vpop.permute.xlu0 %742 }
 0x255   : > { %v814_v14 = vmul.f32 %v743_v12, %v1150_v38  ;;  %v815_v28 = vmul.f32 %v743_v12, %v1153_v39  ;;  %v1045_v38 = vld [vmem:[%s1105_s17 + $0x50] sm:$0xff]  ;;  %v1046_v39 = vld [vmem:[%s1105_s17 + $0x58] sm:$0xff] }
 0x256   : > { %862 = vst [vmem:[%s1550_s4 + $0xa0] sm:$0xff] %v830_v37 }
 0x257   : > { %863 = vst [vmem:[%s1550_s4 + $0xa8] sm:$0xff] %v831_v11 }
 0x258   : > { %846 = vst [vmem:[%s1550_s4 + $0x20] sm:$0xff] %v814_v14 }
 0x259   : > { %847 = vst [vmem:[%s1550_s4 + $0x28] sm:$0xff] %v815_v28  ;;  %v773_v16 = vpop.permute.xlu1 %772 }
 0x25a   : > { %v826_v20 = vmul.f32 %v1043_v18, %v773_v16  ;;  %v827_v30 = vmul.f32 %v1044_v25, %v773_v16 }
 0x25b   : > { %v758_v31 = vpop.permute.xlu2 %757 }
 0x25c   : > { %858 = vst [vmem:[%s1550_s4 + $0x80] sm:$0xff] %v826_v20  ;;  %v820_v54 = vmul.f32 %v1045_v38, %v758_v31  ;;  %v821_v32 = vmul.f32 %v1046_v39, %v758_v31 }
 0x25d   : > { %859 = vst [vmem:[%s1550_s4 + $0x88] sm:$0xff] %v827_v30 }
 0x25e   : > { %852 = vst [vmem:[%s1550_s4 + $0x50] sm:$0xff] %v820_v54 }
 0x25f   : > { %853 = vst [vmem:[%s1550_s4 + $0x58] sm:$0xff] %v821_v32 }
 0x260   : > { %v778_v15 = vpop.permute.xlu0 %777 }
 0x261   : > { %v828_v35 = vmul.f32 %v1047_v21, %v778_v15  ;;  %v829_v42 = vmul.f32 %v1048_v0, %v778_v15 }
 0x263   : > { %v798_v17 = vpop.permute.xlu2 %797  ;;  %860 = vst [vmem:[%s1550_s4 + $0x90] sm:$0xff] %v828_v35 }
 0x264   : > { %v836_v53 = vmul.f32 %v1049_v26, %v798_v17  ;;  %v837_v47 = vmul.f32 %v1050_v44, %v798_v17  ;;  %v753_v48 = vpop.permute.xlu1 %752  ;;  %861 = vst [vmem:[%s1550_s4 + $0x98] sm:$0xff] %v829_v42 }
 0x265   : > { %v818_v8 = vmul.f32 %v1051_v49, %v753_v48  ;;  %v819_v52 = vmul.f32 %v1052_v24, %v753_v48 }
 0x266   : > { %868 = vst [vmem:[%s1550_s4 + $0xd0] sm:$0xff] %v836_v53 }
 0x267   : > { %869 = vst [vmem:[%s1550_s4 + $0xd8] sm:$0xff] %v837_v47 }
 0x268   : > { %850 = vst [vmem:[%s1550_s4 + $0x40] sm:$0xff] %v818_v8  ;;  %v808_v51 = vpop.permute.xlu0 %807 }
 0x269   : > { %851 = vst [vmem:[%s1550_s4 + $0x48] sm:$0xff] %v819_v52  ;;  %v840_v58 = vmul.f32 %v1053_v56, %v808_v51  ;;  %v841_v2 = vmul.f32 %v1054_v60, %v808_v51 }
 0x26b   : > { %872 = vst [vmem:[%s1550_s4 + $0xf0] sm:$0xff] %v840_v58 }
 0x26c   : > { %873 = vst [vmem:[%s1550_s4 + $0xf8] sm:$0xff] %v841_v2 }
 0x26e   : > { %v788_v43 = vpop.permute.xlu1 %787 }
 0x26f   : > { %v832_v63 = vmul.f32 %v1055_v50, %v788_v43  ;;  %v833_v1 = vmul.f32 %v1056_v61, %v788_v43 }
 0x271   : > { %864 = vst [vmem:[%s1550_s4 + $0xb0] sm:$0xff] %v832_v63 }
 0x272   : > { %865 = vst [vmem:[%s1550_s4 + $0xb8] sm:$0xff] %v833_v1 }
 0x276   : > { %v803_v13 = vpop.permute.xlu1 %802 }
 0x277   : > { %v838_v33 = vmul.f32 %v1057_v55, %v803_v13  ;;  %v839_v3 = vmul.f32 %v1058_v29, %v803_v13 }
 0x279   : > { %870 = vst [vmem:[%s1550_s4 + $0xe0] sm:$0xff] %v838_v33 }
 0x27a   : > { %871 = vst [vmem:[%s1550_s4 + $0xe8] sm:$0xff] %v839_v3 }
 0x27b PF: > { %s13_s12 = sadd.s32 1, %s1065_s12  }
 0x27c   : > { %p10_p4 = scmp.ge.s32.totalorder %s13_s12, 4  }
 0x27e   :  { %12 = sbr.rel (!%p10_p4) target bundleno = 1 (0x1), region = 62 }

</bundles_post_ra>
